<compile_context>
chip_gen: v7x
topology: tpu7x:2x2x1
jax: 0.10.0
libtpu: 0.0.40
codegen_flags: <defaults>
</compile_context>

<pallas_src>
import jax
import jax.numpy as jnp
from jax import lax
from jax.experimental import pallas as pl
from jax.experimental.pallas import tpu as pltpu


def _make_pose_loss_kernel(lambda_position, lambda_angle, batch, n_pos_cols, n_ang_cols):
    # Static per-column weights: mean over (batch * cols) elements, scaled by lambda.
    w_pos = float(lambda_position) / float(batch * n_pos_cols)
    w_ang = float(lambda_angle) / float(batch * n_ang_cols)
    d_total = n_pos_cols + n_ang_cols

    def kernel(x_ref, out_ref):
        # x_ref: (2, B, Dp+Da) in native dtype; cast once after load.
        x = x_ref[...].astype(jnp.float32)
        diff = jnp.abs(x[0] - x[1])                                  # (B, Dp+Da)
        # Per-column weight row built from a 2-D iota (no extra DMA, VPU-only).
        col = lax.broadcasted_iota(jnp.int32, (batch, d_total), 1)
        w = jnp.where(col < n_pos_cols,
                      jnp.float32(w_pos), jnp.float32(w_ang))
        # Single fused reduction -> scalar, stored to SMEM.
        out_ref[0] = jnp.sum(diff * w)

    return kernel


def pose_loss(left_position, right_position, left_angle, right_angle,
              lambda_position, lambda_angle,
              right_from_left_transformation=None):
    """Pallas implementation of PoseLoss.forward. Returns a scalar float32."""
    del right_from_left_transformation  # unused in the reference forward pass

    batch, n_pos_cols = left_position.shape
    _, n_ang_cols = left_angle.shape

    # Pack the four tiny tensors into one array so the kernel does a single DMA:
    #   stacked[0] = [left_position  | left_angle ]   (B, Dp+Da)
    #   stacked[1] = [right_position | right_angle]   (B, Dp+Da)
    left = jnp.concatenate([left_position, left_angle], axis=-1)
    right = jnp.concatenate([right_position, right_angle], axis=-1)
    stacked = jnp.stack([left, right], axis=0)                       # (2, B, Dp+Da)

    kernel = _make_pose_loss_kernel(lambda_position, lambda_angle,
                                    batch, n_pos_cols, n_ang_cols)

    out = pl.pallas_call(
        kernel,
        out_shape=jax.ShapeDtypeStruct((1,), jnp.float32),
        in_specs=[pl.BlockSpec(memory_space=pltpu.VMEM)],            # stacked poses
        out_specs=pl.BlockSpec(memory_space=pltpu.SMEM),             # scalar loss
    )(stacked)

    return out[0]


def pose_loss_ref(lp, rp, la, ra, lam_p, lam_a):
    """Pure-JAX reference (mirrors torch.nn.L1Loss with 'mean' reduction)."""
    return (lam_p * jnp.mean(jnp.abs(lp - rp))
            + lam_a * jnp.mean(jnp.abs(la - ra)))


if __name__ == "__main__":
    key = jax.random.PRNGKey(0)
    k1, k2, k3, k4 = jax.random.split(key, 4)

    batch = 8
    left_position = jax.random.normal(k1, (batch, 3), dtype=jnp.float32)
    right_position = jax.random.normal(k2, (batch, 3), dtype=jnp.float32)
    left_angle = jax.random.normal(k3, (batch, 3), dtype=jnp.float32)
    right_angle = jax.random.normal(k4, (batch, 3), dtype=jnp.float32)

    lambda_position = 0.1
    lambda_angle = 1.0
    # Unused by forward; kept only for interface parity with the torch module.
    right_from_left_transformation = jnp.eye(4, dtype=jnp.float32)

    loss = pose_loss(left_position, right_position, left_angle, right_angle,
                     lambda_position, lambda_angle,
                     right_from_left_transformation)
    loss = jax.block_until_ready(loss)

    ref = pose_loss_ref(left_position, right_position, left_angle, right_angle,
                        lambda_position, lambda_angle)
    assert jnp.allclose(loss, ref, rtol=1e-5, atol=1e-6), (loss, ref)

    print("KERNEL_OK")
</pallas_src>

<mosaic_0001>
module attributes {stable_mosaic.version = 11 : i64} {
  func.func @kernel(%arg0: memref<2x8x6xf32, #tpu.memory_space<vmem>>, %arg1: memref<1xf32, #tpu.memory_space<smem>>) attributes {dimension_semantics = [], scalar_prefetch = 0 : i64, scratch_operands = 0 : i64, tpu.core_type = #tpu.core_type<tc>} {
    %c0 = arith.constant 0 : index
    %c0_0 = arith.constant 0 : index
    %c0_1 = arith.constant 0 : index
    %0 = vector.load %arg0[%c0, %c0_0, %c0_1] : memref<2x8x6xf32, #tpu.memory_space<vmem>>, vector<2x8x6xf32>
    %1 = vector.extract_strided_slice %0 {offsets = [0, 0, 0], sizes = [1, 8, 6], strides = [1, 1, 1]} : vector<2x8x6xf32> to vector<1x8x6xf32>
    %2 = vector.shape_cast %1 : vector<1x8x6xf32> to vector<8x6xf32>
    %3 = vector.extract_strided_slice %0 {offsets = [1, 0, 0], sizes = [1, 8, 6], strides = [1, 1, 1]} : vector<2x8x6xf32> to vector<1x8x6xf32>
    %4 = vector.shape_cast %3 : vector<1x8x6xf32> to vector<8x6xf32>
    %5 = arith.subf %2, %4 : vector<8x6xf32>
    %6 = math.absf %5 : vector<8x6xf32>
    %7 = tpu.iota {dimensions = array<i32: 1>} : vector<8x6xi32>
    %c3_i32 = arith.constant 3 : i32
    %8 = vector.broadcast %c3_i32 : i32 to vector<8x6xi32>
    %9 = arith.cmpi slt, %7, %8 : vector<8x6xi32>
    %cst = arith.constant 0.00416666688 : f32
    %cst_2 = arith.constant 0.0416666679 : f32
    %10 = vector.broadcast %cst : f32 to vector<8x6xf32>
    %11 = vector.broadcast %cst_2 : f32 to vector<8x6xf32>
    %12 = arith.select %9, %10, %11 : vector<8x6xi1>, vector<8x6xf32>
    %13 = arith.mulf %6, %12 : vector<8x6xf32>
    %14 = vector.shape_cast %13 : vector<8x6xf32> to vector<1x8x6xf32>
    %cst_3 = arith.constant dense<0.000000e+00> : vector<1xf32>
    %15 = vector.multi_reduction <add>, %14, %cst_3 [1, 2] : vector<1x8x6xf32> to vector<1xf32>
    %16 = vector.shape_cast %15 : vector<1xf32> to vector<1x1x1xf32>
    %17 = vector.extract %16[0, 0, 0] : f32 from vector<1x1x1xf32>
    %c0_4 = arith.constant 0 : index
    %18 = memref.load %arg1[%c0_4] : memref<1xf32, #tpu.memory_space<smem>>
    memref.store %17, %arg1[%c0_4] : memref<1xf32, #tpu.memory_space<smem>>
    return
  }
}

</mosaic_0001>

<bundles_post_ra>
// kernel: tpu_custom_call.1
= control target key start
LH: loop header
LB: loop body
LE: loop exit
PB: predicated region body
PF: predicated region fallthrough
CT: control target
= control target key end

     0   :  { %v13_v2 = vlaneseq  ;;  %s90_s0 = inlined_call_operand.vmem [shape: f32[2,8,6], index: 0, kind: input, shape index: {}]   ;;  %s91_s1 = inlined_call_operand.hbm [shape: f32[1], index: 1, kind: output, shape index: {}]  }
   0x1   :  { %v9_v0 = vld [vmem:[%s90_s0] sm:$0xff]  ;;  %v10_v1 = vld [vmem:[%s90_s0 + $0x8] sm:$0xff] }
   0x2   :  { %v11_v3 = vsub.f32 %v9_v0, %v10_v1 }
   0x3   :  { %6 = vsyncpa [#allocation3], 0  ;;  %v14_v4 = vand.u32 127, %v13_v2  ;;  %v60_v6 = vmov 0.041666668   ;;  %vm18_vm1 = vcmask 48128  }
   0x4   :  { %v12_v5 = vand.u32 2147483647, %v11_v3  ;;  %s48_s12 = scalar_lea.hbm %s91_s1, 16 }
   0x5   :  { %vm15_vm0 = vcmp.lt.s32.totalorder %v14_v4, 3  ;;  %p49_p0 = scmp.ne.s32.totalorder %s91_s1, %s48_s12  ;;  %p52_p1 = scmp.lt.u32.totalorder %s48_s12, %s91_s1 }
   0x6   :  { %v16_v7 = vsel %vm15_vm0, 0.004166667, %v60_v6 }
   0x7   :  { %v17_v8 = vmul.f32 %v16_v7, %v12_v5  ;;  %p54_p2 = pnand %p52_p1, %p49_p0 }
   0x9   :  { %v19_v9 = vsel %vm18_vm1, %v17_v8, 0.0 }
   0xa   :  { %20 = vadd.xlane.f32.xlu0 %v19_v9 }
  0x97   :  { %v21_v10 = vpop.xlane.xlu0 %20 }
  0x98   :  { %v22_v11 = vrot.slane %v21_v10, 4 }
  0x9a   :  { %v23_v12 = vadd.f32 %v22_v11, %v21_v10 }
  0x9c   :  { %v24_v13 = vrot.slane %v23_v12, 2 }
  0x9e   :  { %v25_v14 = vadd.f32 %v24_v13, %v23_v12 }
  0xa0   :  { %v26_v15 = vrot.slane %v25_v14, 1 }
  0xa2   :  { %v27_v16 = vadd.f32 %v26_v15, %v25_v14 }
  0xa4   :  { %44 = vpush %v27_v16 }
  0xd5   :  { %s45_s0 = spop %44 }
  0xd6   :  { %30 = sst [smem:[#allocation2]] %s45_s0 }
  0xd7   :  { %57 = shalt.err (!%p54_p2)
}
  0xd8   :  { %s61_s17 = smov [#allocation2]  }
  0xd9   :  { %38 = dma.smem_to_hbm %s61_s17, 16, %s91_s1, [#allocation3]  }
  0xda   :  { %58 = dma.done.wait [#allocation3], 16  }
  0xdb   :  { %59 = vsyncadd [#allocation3], 4294967280 }
  0xdc   :  { %42 = sfence }
  0xdd   :  { %43 = vsyncpa [#allocation3], 1 }

</bundles_post_ra>
